<compile_context>
chip_gen: v6e
topology: v6e:2x2x1
jax: 0.10.0
libtpu: 0.0.40
codegen_flags: <defaults>
</compile_context>

<pallas_src>
import jax
import jax.numpy as jnp
from jax.experimental import pallas as pl
from jax.experimental.pallas import tpu as pltpu

IN_DIM = 28 * 28    # 784
H1_DIM = 512
H2_DIM = 256


def _leaky_relu(x, slope=0.2):
    return jnp.where(x > 0, x, slope * x)


def discriminator_kernel(x_ref, w1_ref, b1_ref, w2_ref, b2_ref, w3_ref, b3_ref,
                         o_ref):
    # x arrives straight from HBM in f32 (no wrapper cast/pad pass); cast to
    # bf16 on the VPU right before the MXU.
    x = x_ref[...].astype(jnp.bfloat16)                                # (TB, 784)

    # Layer 1: Linear(784 -> 512) + LeakyReLU(0.2); bf16 MXU, f32 accumulate.
    h1 = jnp.dot(x, w1_ref[...], preferred_element_type=jnp.float32)
    h1 = _leaky_relu(h1 + b1_ref[...]).astype(jnp.bfloat16)            # (TB, 512)

    # Layer 2: Linear(512 -> 256) + LeakyReLU(0.2)
    h2 = jnp.dot(h1, w2_ref[...], preferred_element_type=jnp.float32)
    h2 = _leaky_relu(h2 + b2_ref[...]).astype(jnp.bfloat16)            # (TB, 256)

    # Layer 3: Linear(256 -> 1) + Sigmoid, computed as
    #   (1, 256) @ (TB, 256)^T -> (1, TB)
    # so the result is produced lane-dense (batch on the 128-wide lane axis).
    logits = jax.lax.dot_general(
        w3_ref[...], h2,
        dimension_numbers=(((1,), (1,)), ((), ())),
        preferred_element_type=jnp.float32)                            # (1, TB)
    o_ref[...] = jax.nn.sigmoid(logits + b3_ref[...])


def _round_up(n, m):
    return ((n + m - 1) // m) * m


def _tpu_generation():
    try:
        kind = jax.devices()[0].device_kind.lower()
    except Exception:
        return 0
    for gen in (7, 6, 5, 4):
        if ("v%d" % gen) in kind:
            return gen
    return 0


def _tile_config(batch):
    """Per-generation batch tile size + x-pipeline depth.

    v6e/v7x: TB up to 1024 (~17 MiB VMEM, under the 32 MiB scoped default) to
    amortize the ~0.35 us per-grid-step overhead; v6e also gets a 3-deep x
    pipeline. v5e / unknown chips: TB up to 512 under the 16 MiB scoped VMEM
    default. Small batches use a single exact-size tile; v7x splits mid-size
    batches into 2 tiles so both TensorCores get work under the "parallel"
    megacore split.
    """
    gen = _tpu_generation()
    if gen >= 7:
        tb_max, bufs = 1024, 2
    elif gen == 6:
        tb_max, bufs = 1024, 3
    else:
        tb_max, bufs = 512, 2

    if batch <= tb_max:
        tb = batch                                   # block dim == full array dim
        if gen >= 7 and batch > 256:
            tb = _round_up(pl.cdiv(batch, 2), 8)     # 2 tiles -> both TCs busy
    else:
        tb = tb_max                                  # multiple of 8 (and 128)
    return max(tb, 1), bufs


def _x_block_spec(tb, bufs):
    """x activation spec; 3-deep pipelining only when requested and available."""
    if bufs > 2 and hasattr(pl, "Buffered"):
        try:
            return pl.BlockSpec((tb, IN_DIM), lambda i: (i, 0),
                                pipeline_mode=pl.Buffered(bufs))
        except TypeError:
            pass
    return pl.BlockSpec((tb, IN_DIM), lambda i: (i, 0))


def discriminator_forward(x_nchw, params):
    """x_nchw: (B, 1, 28, 28) float32 -> (B, 1) float32 probabilities."""
    w1, b1, w2, b2, w3, b3 = params
    B = x_nchw.shape[0]

    # Flatten exactly like torch .view (row-major over C, H, W). Stays f32:
    # the bf16 cast happens inside the kernel, so no extra HBM round-trip.
    x_flat = x_nchw.reshape(B, IN_DIM)

    tb, bufs = _tile_config(B)
    num_tiles = pl.cdiv(B, tb)
    b_pad = num_tiles * tb
    bufs_eff = bufs if num_tiles > 2 else 2          # extra buffer only pays off
                                                     # on longer grids

    # bf16 weights (f32 accumulation inside the kernel), f32 biases.
    w1b = w1.astype(jnp.bfloat16)                                      # (784, 512)
    w2b = w2.astype(jnp.bfloat16)                                      # (512, 256)
    w3b = w3.reshape(1, H2_DIM).astype(jnp.bfloat16)                   # (1, 256)
    b1f = b1.reshape(1, H1_DIM).astype(jnp.float32)                    # (1, 512)
    b2f = b2.reshape(1, H2_DIM).astype(jnp.float32)                    # (1, 256)
    b3f = b3.reshape(1, 1).astype(jnp.float32)                         # (1, 1)

    flops = 2 * b_pad * (IN_DIM * H1_DIM + H1_DIM * H2_DIM + H2_DIM)
    bytes_accessed = (b_pad * IN_DIM * 4                               # x (f32)
                      + (IN_DIM * H1_DIM + H1_DIM * H2_DIM + H2_DIM) * 2
                      + (H1_DIM + H2_DIM + 1) * 4                      # biases
                      + b_pad * 4)                                     # output

    out_row = pl.pallas_call(
        discriminator_kernel,
        out_shape=jax.ShapeDtypeStruct((1, b_pad), jnp.float32),
        grid=(num_tiles,),
        in_specs=[
            # Activations: one (tb, 784) f32 tile per grid step (pipelined DMA).
            # Last partial tile: out-of-bounds rows hold unspecified data; they
            # never mix with valid rows (all ops are row-independent) and the
            # wrapper slices them away.
            _x_block_spec(tb, bufs_eff),
            # Weights / biases: constant index_map -> fetched once, VMEM-resident.
            pl.BlockSpec((IN_DIM, H1_DIM), lambda i: (0, 0)),
            pl.BlockSpec((1, H1_DIM), lambda i: (0, 0)),
            pl.BlockSpec((H1_DIM, H2_DIM), lambda i: (0, 0)),
            pl.BlockSpec((1, H2_DIM), lambda i: (0, 0)),
            pl.BlockSpec((1, H2_DIM), lambda i: (0, 0)),
            pl.BlockSpec((1, 1), lambda i: (0, 0)),
        ],
        # Lane-dense output: batch lives on the lane axis in tb-wide chunks.
        out_specs=pl.BlockSpec((1, tb), lambda i: (0, i)),
        compiler_params=pltpu.CompilerParams(
            dimension_semantics=("parallel",)),
        cost_estimate=pl.CostEstimate(
            flops=flops, transcendentals=2 * b_pad,
            bytes_accessed=bytes_accessed),
    )(x_flat, w1b, b1f, w2b, b2f, w3b, b3f)

    return out_row[0, :B].reshape(B, 1)


def init_params(key):
    """Deterministic init mimicking nn.Linear's U(-1/sqrt(fan_in), +1/sqrt(fan_in)).
    Weights are stored (in_features, out_features)."""
    def linear(key, fan_in, fan_out):
        kw, kb = jax.random.split(key)
        bound = 1.0 / jnp.sqrt(fan_in)
        w = jax.random.uniform(kw, (fan_in, fan_out), jnp.float32, -bound, bound)
        b = jax.random.uniform(kb, (1, fan_out), jnp.float32, -bound, bound)
        return w, b

    k1, k2, k3 = jax.random.split(key, 3)
    w1, b1 = linear(k1, IN_DIM, H1_DIM)
    w2, b2 = linear(k2, H1_DIM, H2_DIM)
    w3, b3 = linear(k3, H2_DIM, 1)
    return (w1, b1, w2, b2, w3, b3)


def _reference(x_nchw, params):
    """Pure-JAX reference applying the same bf16 casts as the kernel."""
    w1, b1, w2, b2, w3, b3 = params
    bf = jnp.bfloat16
    xf = x_nchw.reshape(x_nchw.shape[0], -1).astype(bf)
    h1 = jnp.dot(xf, w1.astype(bf), preferred_element_type=jnp.float32) + b1
    h1 = jnp.where(h1 > 0, h1, 0.2 * h1).astype(bf)
    h2 = jnp.dot(h1, w2.astype(bf), preferred_element_type=jnp.float32) + b2
    h2 = jnp.where(h2 > 0, h2, 0.2 * h2).astype(bf)
    h3 = jnp.dot(h2, w3.astype(bf), preferred_element_type=jnp.float32) + b3
    return jax.nn.sigmoid(h3)


if __name__ == "__main__":
    key = jax.random.PRNGKey(0)
    kx, kp = jax.random.split(key)

    # Small batch of MNIST-shaped inputs (NCHW like the PyTorch module).
    x = jax.random.normal(kx, (2, 1, 28, 28), dtype=jnp.float32)
    params = init_params(kp)

    out = discriminator_forward(x, params)
    out = jax.block_until_ready(out)

    ref = _reference(x, params)
    assert out.shape == (2, 1)
    assert jnp.allclose(out, ref, atol=1e-2, rtol=1e-2), (out, ref)

    print("KERNEL_OK")
</pallas_src>

<mosaic_0001>
module attributes {stable_mosaic.version = 11 : i64} {
  func.func @discriminator_kernel(%arg0: i32, %arg1: memref<2x784xf32, #tpu.memory_space<vmem>>, %arg2: memref<784x512xbf16, #tpu.memory_space<vmem>>, %arg3: memref<1x512xf32, #tpu.memory_space<vmem>>, %arg4: memref<512x256xbf16, #tpu.memory_space<vmem>>, %arg5: memref<1x256xf32, #tpu.memory_space<vmem>>, %arg6: memref<1x256xbf16, #tpu.memory_space<vmem>>, %arg7: memref<1x1xf32, #tpu.memory_space<vmem>>, %arg8: memref<1x2xf32, #tpu.memory_space<vmem>>) attributes {dimension_semantics = [#tpu.dimension_semantics<parallel>], iteration_bounds = array<i64: 1>, scalar_prefetch = 0 : i64, scratch_operands = 0 : i64, tpu.core_type = #tpu.core_type<tc>, window_params = [{transform_indices = @transform_0, window_bounds = array<i64: 2, 784>}, {pipeline_mode = #tpu.pipeline_mode<synchronous>, transform_indices = @transform_1, window_bounds = array<i64: 784, 512>}, {pipeline_mode = #tpu.pipeline_mode<synchronous>, transform_indices = @transform_2, window_bounds = array<i64: 1, 512>}, {pipeline_mode = #tpu.pipeline_mode<synchronous>, transform_indices = @transform_3, window_bounds = array<i64: 512, 256>}, {pipeline_mode = #tpu.pipeline_mode<synchronous>, transform_indices = @transform_4, window_bounds = array<i64: 1, 256>}, {pipeline_mode = #tpu.pipeline_mode<synchronous>, transform_indices = @transform_5, window_bounds = array<i64: 1, 256>}, {pipeline_mode = #tpu.pipeline_mode<synchronous>, transform_indices = @transform_6, window_bounds = array<i64: 1, 1>}, {transform_indices = @transform_7, window_bounds = array<i64: 1, 2>}]} {
    %c0 = arith.constant 0 : index
    %c0_0 = arith.constant 0 : index
    %0 = vector.load %arg1[%c0, %c0_0] : memref<2x784xf32, #tpu.memory_space<vmem>>, vector<2x784xf32>
    %1 = arith.truncf %0 : vector<2x784xf32> to vector<2x784xbf16>
    %c0_1 = arith.constant 0 : index
    %c0_2 = arith.constant 0 : index
    %2 = vector.load %arg2[%c0_1, %c0_2] : memref<784x512xbf16, #tpu.memory_space<vmem>>, vector<784x512xbf16>
    %cst = arith.constant dense<0.000000e+00> : vector<2x512xf32>
    %3 = tpu.matmul %1, %2, %cst {dimension_numbers = #tpu.dot_dimension_numbers<[1], [0], [0], [1], [0, 0, 1, 1], [], []>} : vector<2x784xbf16>, vector<784x512xbf16>, vector<2x512xf32> -> vector<2x512xf32>
    %c0_3 = arith.constant 0 : index
    %c0_4 = arith.constant 0 : index
    %4 = vector.load %arg3[%c0_3, %c0_4] : memref<1x512xf32, #tpu.memory_space<vmem>>, vector<1x512xf32>
    %5 = vector.broadcast %4 : vector<1x512xf32> to vector<2x512xf32>
    %6 = arith.addf %3, %5 : vector<2x512xf32>
    %cst_5 = arith.constant 0.000000e+00 : f32
    %7 = vector.broadcast %cst_5 : f32 to vector<2x512xf32>
    %8 = arith.cmpf ogt, %6, %7 : vector<2x512xf32>
    %cst_6 = arith.constant 2.000000e-01 : f32
    %9 = vector.broadcast %cst_6 : f32 to vector<2x512xf32>
    %10 = arith.mulf %9, %6 : vector<2x512xf32>
    %11 = arith.select %8, %6, %10 : vector<2x512xi1>, vector<2x512xf32>
    %12 = arith.truncf %11 : vector<2x512xf32> to vector<2x512xbf16>
    %c0_7 = arith.constant 0 : index
    %c0_8 = arith.constant 0 : index
    %13 = vector.load %arg4[%c0_7, %c0_8] : memref<512x256xbf16, #tpu.memory_space<vmem>>, vector<512x256xbf16>
    %cst_9 = arith.constant dense<0.000000e+00> : vector<2x256xf32>
    %14 = tpu.matmul %12, %13, %cst_9 {dimension_numbers = #tpu.dot_dimension_numbers<[1], [0], [0], [1], [0, 0, 1, 1], [], []>} : vector<2x512xbf16>, vector<512x256xbf16>, vector<2x256xf32> -> vector<2x256xf32>
    %c0_10 = arith.constant 0 : index
    %c0_11 = arith.constant 0 : index
    %15 = vector.load %arg5[%c0_10, %c0_11] : memref<1x256xf32, #tpu.memory_space<vmem>>, vector<1x256xf32>
    %16 = vector.broadcast %15 : vector<1x256xf32> to vector<2x256xf32>
    %17 = arith.addf %14, %16 : vector<2x256xf32>
    %cst_12 = arith.constant 0.000000e+00 : f32
    %18 = vector.broadcast %cst_12 : f32 to vector<2x256xf32>
    %19 = arith.cmpf ogt, %17, %18 : vector<2x256xf32>
    %cst_13 = arith.constant 2.000000e-01 : f32
    %20 = vector.broadcast %cst_13 : f32 to vector<2x256xf32>
    %21 = arith.mulf %20, %17 : vector<2x256xf32>
    %22 = arith.select %19, %17, %21 : vector<2x256xi1>, vector<2x256xf32>
    %23 = arith.truncf %22 : vector<2x256xf32> to vector<2x256xbf16>
    %c0_14 = arith.constant 0 : index
    %c0_15 = arith.constant 0 : index
    %24 = vector.load %arg6[%c0_14, %c0_15] : memref<1x256xbf16, #tpu.memory_space<vmem>>, vector<1x256xbf16>
    %cst_16 = arith.constant dense<0.000000e+00> : vector<1x2xf32>
    %25 = tpu.matmul %24, %23, %cst_16 {dimension_numbers = #tpu.dot_dimension_numbers<[1], [1], [0], [0], [0, 0, 1, 0], [], []>} : vector<1x256xbf16>, vector<2x256xbf16>, vector<1x2xf32> -> vector<1x2xf32>
    %c0_17 = arith.constant 0 : index
    %c0_18 = arith.constant 0 : index
    %26 = vector.load %arg7[%c0_17, %c0_18] : memref<1x1xf32, #tpu.memory_space<vmem>>, vector<1x1xf32>
    %27 = vector.broadcast %26 : vector<1x1xf32> to vector<1x2xf32>
    %28 = arith.addf %25, %27 : vector<1x2xf32>
    %29 = arith.negf %28 : vector<1x2xf32>
    %30 = math.exp %29 : vector<1x2xf32>
    %cst_19 = arith.constant 1.000000e+00 : f32
    %31 = vector.broadcast %cst_19 : f32 to vector<1x2xf32>
    %32 = arith.addf %31, %30 : vector<1x2xf32>
    %33 = arith.divf %31, %32 : vector<1x2xf32>
    %c0_20 = arith.constant 0 : index
    %c0_21 = arith.constant 0 : index
    %34 = vector.load %arg8[%c0_20, %c0_21] : memref<1x2xf32, #tpu.memory_space<vmem>>, vector<1x2xf32>
    tpu.vector_store %arg8[%c0_20, %c0_21], %33 {strides = array<i32>} : memref<1x2xf32, #tpu.memory_space<vmem>>, vector<1x2xf32>,
    return
  }
  func.func @transform_0(%arg0: i32) -> (i32, i32) {
    %c0_i32 = arith.constant 0 : i32
    %c0_i32_0 = arith.constant 0 : i32
    return %arg0, %c0_i32 : i32, i32
  }
  func.func @transform_1(%arg0: i32) -> (i32, i32) {
    %c0_i32 = arith.constant 0 : i32
    %c0_i32_0 = arith.constant 0 : i32
    %c0_i32_1 = arith.constant 0 : i32
    return %c0_i32, %c0_i32_0 : i32, i32
  }
  func.func @transform_2(%arg0: i32) -> (i32, i32) {
    %c0_i32 = arith.constant 0 : i32
    %c0_i32_0 = arith.constant 0 : i32
    %c0_i32_1 = arith.constant 0 : i32
    return %c0_i32, %c0_i32_0 : i32, i32
  }
  func.func @transform_3(%arg0: i32) -> (i32, i32) {
    %c0_i32 = arith.constant 0 : i32
    %c0_i32_0 = arith.constant 0 : i32
    %c0_i32_1 = arith.constant 0 : i32
    return %c0_i32, %c0_i32_0 : i32, i32
  }
  func.func @transform_4(%arg0: i32) -> (i32, i32) {
    %c0_i32 = arith.constant 0 : i32
    %c0_i32_0 = arith.constant 0 : i32
    %c0_i32_1 = arith.constant 0 : i32
    return %c0_i32, %c0_i32_0 : i32, i32
  }
  func.func @transform_5(%arg0: i32) -> (i32, i32) {
    %c0_i32 = arith.constant 0 : i32
    %c0_i32_0 = arith.constant 0 : i32
    %c0_i32_1 = arith.constant 0 : i32
    return %c0_i32, %c0_i32_0 : i32, i32
  }
  func.func @transform_6(%arg0: i32) -> (i32, i32) {
    %c0_i32 = arith.constant 0 : i32
    %c0_i32_0 = arith.constant 0 : i32
    %c0_i32_1 = arith.constant 0 : i32
    return %c0_i32, %c0_i32_0 : i32, i32
  }
  func.func @transform_7(%arg0: i32) -> (i32, i32) {
    %c0_i32 = arith.constant 0 : i32
    %c0_i32_0 = arith.constant 0 : i32
    return %c0_i32, %arg0 : i32, i32
  }
}

</mosaic_0001>

<bundles_post_ra>
// kernel: tpu_custom_call.1
= control target key start
LH: loop header
LB: loop body
LE: loop exit
PB: predicated region body
PF: predicated region fallthrough
CT: control target
= control target key end

     0   :  { %s3147_s0 = inlined_call_operand.hbm [shape: f32[2,784], index: 0, kind: input, shape index: {}]   ;;  %s3148_s1 = inlined_call_operand.hbm [shape: bf16[784,512], index: 1, kind: input, shape index: {}]   ;;  %s3149_s2 = inlined_call_operand.vmem [shape: f32[1,512], index: 2, kind: input, shape index: {}]   ;;  %s3150_s3 = inlined_call_operand.hbm [shape: bf16[512,256], index: 3, kind: input, shape index: {}]   ;;  %s3151_s4 = inlined_call_operand.vmem [shape: f32[1,256], index: 4, kind: input, shape index: {}]   ;;  %s3152_s5 = inlined_call_operand.vmem [shape: bf16[1,256], index: 5, kind: input, shape index: {}]   ;;  %s3153_s6 = inlined_call_operand.<no memory space> [shape: f32[1,1], index: 6, kind: input, shape index: {}]   ;;  %s3154_s7 = inlined_call_operand.hbm [shape: f32[1,2], index: 7, kind: output, shape index: {}]  }
   0x1   :  { %v12_v0 = vstv %s3153_s6 }
   0x2   :  { %13 = vst [vmem:[#allocation2] sm:$0x1] %v12_v0 }
   0x3   :  { %14 = vsyncpa [#allocation4], 0 }
   0x4   :  { %15 = vsyncpa [#allocation7], 0 }
   0x5   :  { %16 = vsyncpa [#allocation5], 0  ;;  %s3010_s26 = smov [#allocation6]  }
   0x6   :  { %s32_s27 = sshll.u32 %s3010_s26, 4  ;;  %s33_s27 = int_to_ptr.vmem [resolvable:$true] %s32_s27 }
   0x7   :  { %s2932_s28 = scalar_lea.vmem %s33_s27, 25088  ;;  %p2937_p1 = scmp.lt.s32.totalorder %s33_s27, %s33_s27 }
   0x8   :  { %p2933_p0 = scmp.ne.s32.totalorder %s33_s27, %s2932_s28  ;;  %p2938_p2 = scmp.lt.s32.totalorder %s2932_s28, %s2932_s28 }
   0xa   :  { %p2939_p3 = por %p2938_p2, %p2937_p1 }
   0xc   :  { %p2940_p4 = pnand %p2939_p3, %p2933_p0 }
   0xe   :  { %2943 = shalt.err (!%p2940_p4)
}
   0xf   :  { %s3011_s29 = smov 256   ;;  %s3012_s30 = smov 16  }
  0x10   :  { %38 = dma.hbm_to_vmem [thread:$0]  %s3148_s1, 25088, %s33_s27, [#allocation7], %s3011_s29, %s3011_s29, %s3012_s30  }
  0x11   :  { %s3013_s6 = smov [#allocation3]   ;;  %s3014_s11 = smov [#allocation8]  }
  0x12   :  { %s23_s10 = sshll.u32 %s3013_s6, 4  ;;  %s46_s12 = sshll.u32 %s3014_s11, 4  ;;  %s24_s10 = int_to_ptr.vmem [resolvable:$true] %s23_s10  ;;  %s47_s12 = int_to_ptr.vmem [resolvable:$true] %s46_s12 }
  0x13   :  { %s2952_s13 = scalar_lea.vmem %s24_s10, 224  ;;  %p2957_p6 = scmp.lt.s32.totalorder %s24_s10, %s24_s10 }
  0x14   :  { %p2953_p5 = scmp.ne.s32.totalorder %s24_s10, %s2952_s13  ;;  %p2958_p7 = scmp.lt.s32.totalorder %s2952_s13, %s2952_s13 }
  0x16   :  { %p2959_p8 = por %p2958_p7, %p2957_p6 }
  0x18   :  { %p2960_p9 = pnand %p2959_p8, %p2953_p5 }
  0x1a   :  { %2963 = shalt.err (!%p2960_p9)
}
  0x1b   :  { %26 = dma.hbm_to_vmem [thread:$0]  %s3147_s0, 224, %s24_s10, [#allocation4]  }
  0x1c   :  { %s2972_s16 = scalar_lea.vmem %s47_s12, 8192  ;;  %p2977_p11 = scmp.lt.s32.totalorder %s47_s12, %s47_s12 }
  0x1d   :  { %p2973_p10 = scmp.ne.s32.totalorder %s47_s12, %s2972_s16  ;;  %p2978_p12 = scmp.lt.s32.totalorder %s2972_s16, %s2972_s16 }
  0x1f   :  { %p2979_p13 = por %p2978_p12, %p2977_p11 }
  0x21   :  { %p2980_p0 = pnand %p2979_p13, %p2973_p10 }
  0x23   :  { %2983 = shalt.err (!%p2980_p0)
}
  0x24   :  { %s3015_s1 = smov 128   ;;  %s3016_s17 = smov 8  }
  0x25   :  { %52 = dma.hbm_to_vmem [thread:$0]  %s3150_s3, 8192, %s47_s12, [#allocation7], %s3015_s1, %s3015_s1, %s3016_s17  }
  0x26   :  { %3004 = dma.done.wait [#allocation4], 224  }
  0x27   :  { %3005 = vsyncadd [#allocation4], 4294967072 }
  0x28   :  { %3006 = dma.done.wait [#allocation7], 33280  }
  0x29   :  { %3007 = vsyncadd [#allocation7], 4294934016  ;;  %v3017_v1 = vmov 0   ;;  %v2528_v2 = vld [vmem:[#allocation6 + $0xe4] ss:$16 sps:$4 sm:$0xff]   ;;  %v77_v40 = vlaneseq  ;;  %vm1318_vm0 = vcmask 130048  }
  0x2a   :  { %2527 = vset.pattern.permute.xlu0 %v3017_v1  ;;  %v2530_v3 = vld [vmem:[#allocation6 + $0x2e4] ss:$16 sps:$4 sm:$0xff]   ;;  %1322 = vmatprep.subr.bf16.mxu0 %v2528_v2  ;;  %v2532_v4 = vld [vmem:[#allocation6 + $0xe0] ss:$16 sps:$4 sm:$0xff]   ;;  %v3018_v38 = vmov 1983009808  }
  0x2b   :  { %v2533_v5 = vld [vmem:[#allocation6 + $0x2e0] ss:$16 sps:$4 sm:$0xff]   ;;  %1363 = vmatprep.subr.bf16.mxu1 %v2530_v3  ;;  %v2534_v6 = vld [vmem:[#allocation6 + $0xc4] ss:$16 sps:$4 sm:$0xff]   ;;  %1323 = vmatpush1.bf16.msra.mxu0 %v2532_v4  ;;  %v75_v39 = vunpack.c.l.s4 %v3018_v38  ;;  %v3074_v45 = vshrl.u32 %v77_v40, 7  ;;  %vm2234_vm7 = vcmask 8192  }
  0x2c   :  { %1364 = vmatpush1.bf16.msra.mxu1 %v2533_v5  ;;  %v2536_v7 = vld [vmem:[#allocation6 + $0x2c4] ss:$16 sps:$4 sm:$0xff]   ;;  %v2538_v8 = vld [vmem:[#allocation6 + $0xc0] ss:$16 sps:$4 sm:$0xff]   ;;  %1324 = vmatprep.subr.bf16.mxu0 %v2534_v6  ;;  %v2641_v38 = vld [vmem:[#allocation6 + $0xc8] ss:$16 sps:$4 sm:$0xff]  }
  0x2d   :  { %v2539_v9 = vld [vmem:[#allocation6 + $0x2c0] ss:$16 sps:$4 sm:$0xff]   ;;  %1365 = vmatprep.subr.bf16.mxu1 %v2536_v7  ;;  %v2540_v10 = vld [vmem:[#allocation6 + $0xa4] ss:$16 sps:$4 sm:$0xff]   ;;  %v76_v44 = vunpack.c.0.s8 %v75_v39  ;;  %v2649_v40 = vld [vmem:[#allocation6 + $0xac] ss:$16 sps:$4 sm:$0xff]  }
  0x2e   :  { %v2542_v11 = vld [vmem:[#allocation6 + $0x2a4] ss:$16 sps:$4 sm:$0xff]   ;;  %v2544_v12 = vld [vmem:[#allocation6 + $0xa0] ss:$16 sps:$4 sm:$0xff]  }
  0x2f   :  { %v2545_v13 = vld [vmem:[#allocation6 + $0x2a0] ss:$16 sps:$4 sm:$0xff]   ;;  %1325 = vmatpush1.bf16.msra.mxu0 %v2538_v8  ;;  %v2546_v14 = vld [vmem:[#allocation6 + $0x84] ss:$16 sps:$4 sm:$0xff]   ;;  %v3077_v51 = vsub.s32 %v76_v44, %v3074_v45  ;;  %v2655_v44 = vld [vmem:[#allocation6 + $0x8c] ss:$16 sps:$4 sm:$0xff]  }
  0x30   :  { %1366 = vmatpush1.bf16.msra.mxu1 %v2539_v9  ;;  %1326 = vmatprep.subr.bf16.mxu0 %v2540_v10  ;;  %v2548_v15 = vld [vmem:[#allocation6 + $0x284] ss:$16 sps:$4 sm:$0xff]   ;;  %v2550_v16 = vld [vmem:[#allocation6 + $0x80] ss:$16 sps:$4 sm:$0xff]  }
  0x31   :  { %1367 = vmatprep.subr.bf16.mxu1 %v2542_v11  ;;  %v2551_v17 = vld [vmem:[#allocation6 + $0x280] ss:$16 sps:$4 sm:$0xff]   ;;  %v2552_v18 = vld [vmem:[#allocation6 + $0x64] ss:$16 sps:$4 sm:$0xff]  }
  0x32   :  { %v2554_v19 = vld [vmem:[#allocation6 + $0x264] ss:$16 sps:$4 sm:$0xff]   ;;  %v2556_v20 = vld [vmem:[#allocation6 + $0x60] ss:$16 sps:$4 sm:$0xff]  }
  0x33   :  { %1327 = vmatpush1.bf16.msra.mxu0 %v2544_v12  ;;  %v2557_v21 = vld [vmem:[#allocation6 + $0x260] ss:$16 sps:$4 sm:$0xff]   ;;  %v2558_v22 = vld [vmem:[#allocation6 + $0x44] ss:$16 sps:$4 sm:$0xff]  }
  0x34   :  { %1368 = vmatpush1.bf16.msra.mxu1 %v2545_v13  ;;  %1328 = vmatprep.subr.bf16.mxu0 %v2546_v14  ;;  %v2560_v23 = vld [vmem:[#allocation6 + $0x244] ss:$16 sps:$4 sm:$0xff]   ;;  %v2562_v24 = vld [vmem:[#allocation6 + $0x40] ss:$16 sps:$4 sm:$0xff]  }
  0x35   :  { %1369 = vmatprep.subr.bf16.mxu1 %v2548_v15  ;;  %v2563_v25 = vld [vmem:[#allocation6 + $0x240] ss:$16 sps:$4 sm:$0xff]   ;;  %v2564_v26 = vld [vmem:[#allocation6 + $0x24] ss:$16 sps:$4 sm:$0xff]   ;;  %v70_v15 = vld [vmem:[#allocation3 + $0x8] sm:$0x3f] }
  0x36   :  { %v2566_v27 = vld [vmem:[#allocation6 + $0x224] ss:$16 sps:$4 sm:$0xff]   ;;  %v2568_v28 = vld [vmem:[#allocation6 + $0x20] ss:$16 sps:$4 sm:$0xff]  }
  0x37   :  { %1329 = vmatpush1.bf16.msra.mxu0 %v2550_v16  ;;  %v2569_v29 = vld [vmem:[#allocation6 + $0x220] ss:$16 sps:$4 sm:$0xff]   ;;  %v2570_v30 = vld [vmem:[#allocation6 + $0x4] ss:$16 sps:$4 sm:$0xff]   ;;  %v3088_v16 = vrot.slane %v70_v15, %v3077_v51 }
  0x38   :  { %1370 = vmatpush1.bf16.msra.mxu1 %v2551_v17  ;;  %1330 = vmatprep.subr.bf16.mxu0 %v2552_v18  ;;  %v2572_v31 = vld [vmem:[#allocation6 + $0x204] ss:$16 sps:$4 sm:$0xff]   ;;  %v2574_v32 = vld [vmem:[#allocation6] ss:$16 sps:$4 sm:$0xff]  }
  0x39   :  { %1371 = vmatprep.subr.bf16.mxu1 %v2554_v19  ;;  %v2575_v33 = vld [vmem:[#allocation6 + $0x200] ss:$16 sps:$4 sm:$0xff]   ;;  %v2576_v34 = vld [vmem:[#allocation6 + $0x1e4] ss:$16 sps:$4 sm:$0xff]  }
  0x3a   :  { %v2578_v35 = vld [vmem:[#allocation6 + $0x3e4] ss:$16 sps:$4 sm:$0xff]   ;;  %v2580_v36 = vld [vmem:[#allocation6 + $0x1e0] ss:$16 sps:$4 sm:$0xff]  }
  0x3b   :  { %1331 = vmatpush1.bf16.msra.mxu0 %v2556_v20  ;;  %v2581_v37 = vld [vmem:[#allocation6 + $0x3e0] ss:$16 sps:$4 sm:$0xff]   ;;  %v2582_v41 = vld [vmem:[#allocation6 + $0x1c4] ss:$16 sps:$4 sm:$0xff]  }
  0x3c   :  { %1372 = vmatpush1.bf16.msra.mxu1 %v2557_v21  ;;  %1332 = vmatprep.subr.bf16.mxu0 %v2558_v22  ;;  %v2584_v42 = vld [vmem:[#allocation6 + $0x3c4] ss:$16 sps:$4 sm:$0xff]   ;;  %v2586_v43 = vld [vmem:[#allocation6 + $0x1c0] ss:$16 sps:$4 sm:$0xff]   ;;  %v105_v21 = vcombine.high %v3088_v16, %v3088_v16 }
  0x3d   :  { %1373 = vmatprep.subr.bf16.mxu1 %v2560_v23  ;;  %v2587_v46 = vld [vmem:[#allocation6 + $0x3c0] ss:$16 sps:$4 sm:$0xff]   ;;  %v2588_v47 = vld [vmem:[#allocation6 + $0x1a4] ss:$16 sps:$4 sm:$0xff]  }
  0x3e   :  { %v2590_v48 = vld [vmem:[#allocation6 + $0x3a4] ss:$16 sps:$4 sm:$0xff]   ;;  %v2592_v49 = vld [vmem:[#allocation6 + $0x1a0] ss:$16 sps:$4 sm:$0xff]  }
  0x3f   :  { %1333 = vmatpush1.bf16.msra.mxu0 %v2562_v24  ;;  %v2593_v50 = vld [vmem:[#allocation6 + $0x3a0] ss:$16 sps:$4 sm:$0xff]   ;;  %v2594_v52 = vld [vmem:[#allocation6 + $0x184] ss:$16 sps:$4 sm:$0xff]   ;;  %v90_v24 = vcombine.high %v70_v15, %v70_v15  ;;  %v2703_v15 = vld [vmem:[#allocation6 + $0x18c] ss:$16 sps:$4 sm:$0xff]  }
  0x40   :  { %1374 = vmatpush1.bf16.msra.mxu1 %v2563_v25  ;;  %1334 = vmatprep.subr.bf16.mxu0 %v2564_v26  ;;  %v2596_v53 = vld [vmem:[#allocation6 + $0x384] ss:$16 sps:$4 sm:$0xff]   ;;  %v2598_v55 = vld [vmem:[#allocation6 + $0x180] ss:$16 sps:$4 sm:$0xff]  }
  0x41   :  { %1375 = vmatprep.subr.bf16.mxu1 %v2566_v27  ;;  %v69_v54 = vld [vmem:[#allocation3] sm:$0xff] }
  0x42   :  { %v80_v56 = vrot.slane %v69_v54, %v3077_v51  ;;  %v73_v57 = vcombine.high %v69_v54, %v69_v54  ;;  %v2599_v58 = vld [vmem:[#allocation6 + $0x380] ss:$16 sps:$4 sm:$0xff]   ;;  %v2600_v59 = vld [vmem:[#allocation6 + $0x164] ss:$16 sps:$4 sm:$0xff]  }
  0x43   :  { %1335 = vmatpush1.bf16.msra.mxu0 %v2568_v28  ;;  %v2602_v60 = vld [vmem:[#allocation6 + $0x364] ss:$16 sps:$4 sm:$0xff]   ;;  %v2604_v63 = vld [vmem:[#allocation6 + $0x160] ss:$16 sps:$4 sm:$0xff]   ;;  %v2636_v28 = vld [vmem:[#allocation6 + $0xec] ss:$16 sps:$4 sm:$0xff]  }
  0x44   :  { %1376 = vmatpush1.bf16.msra.mxu1 %v2569_v29  ;;  %1336 = vmatprep.subr.bf16.mxu0 %v2570_v30  ;;  %v88_v61 = vcombine.high %v80_v56, %v80_v56  ;;  %v87_v62 = vrot.slane %v73_v57, %v3077_v51  ;;  %v2605_v3 = vld [vmem:[#allocation6 + $0x360] ss:$16 sps:$4 sm:$0xff]   ;;  %v2606_v4 = vld [vmem:[#allocation6 + $0x144] ss:$16 sps:$4 sm:$0xff]   ;;  %v3092_v22 = vpack.c.bf16 %v80_v56, %v80_v56  ;;  %v2673_v57 = vld [vmem:[#allocation6 + $0x2c] ss:$16 sps:$4 sm:$0xff]  }
  0x45   :  { %1377 = vmatprep.subr.bf16.mxu1 %v2572_v31  ;;  %v2608_v5 = vld [vmem:[#allocation6 + $0x344] ss:$16 sps:$4 sm:$0xff]   ;;  %v2610_v7 = vld [vmem:[#allocation6 + $0x140] ss:$16 sps:$4 sm:$0xff]   ;;  %v3096_v29 = vpack.c.bf16 %v105_v21, %v105_v21  ;;  %v104_v30 = vrot.slane %v90_v24, %v3077_v51  ;;  %v2659_v51 = vld [vmem:[#allocation6 + $0x68] ss:$16 sps:$4 sm:$0xff]  }
  0x46   :  { %v3081_v0 = vpack.c.bf16 %v88_v61, %v88_v61  ;;  %v89_v2 = vcombine.high %v87_v62, %v87_v62  ;;  %v2611_v8 = vld [vmem:[#allocation6 + $0x340] ss:$16 sps:$4 sm:$0xff]   ;;  %v2612_v9 = vld [vmem:[#allocation6 + $0x124] ss:$16 sps:$4 sm:$0xff]   ;;  %v3094_v23 = vpack.c.bf16 %v87_v62, %v87_v62  ;;  %v2679_v61 = vld [vmem:[#allocation6 + $0xc] ss:$16 sps:$4 sm:$0xff]  }
  0x47   :  { %1337 = vmatpush1.bf16.msra.mxu0 %v2574_v32  ;;  %v2614_v10 = vld [vmem:[#allocation6 + $0x324] ss:$16 sps:$4 sm:$0xff]   ;;  %v2616_v11 = vld [vmem:[#allocation6 + $0x120] ss:$16 sps:$4 sm:$0xff]   ;;  %v2707_v24 = vld [vmem:[#allocation6 + $0x168] ss:$16 sps:$4 sm:$0xff]  }
  0x48   :  { %1378 = vmatpush1.bf16.msra.mxu1 %v2575_v33  ;;  %1338 = vmatprep.subr.bf16.mxu0 %v2576_v34  ;;  %v3083_v6 = vpack.c.bf16 %v89_v2, %v89_v2  ;;  %v2617_v12 = vld [vmem:[#allocation6 + $0x320] ss:$16 sps:$4 sm:$0xff]   ;;  %v2618_v13 = vld [vmem:[#allocation6 + $0x104] ss:$16 sps:$4 sm:$0xff]   ;;  %v3103_v33 = vpack.c.bf16 %v104_v30, %v104_v30  ;;  %v2634_v34 = vld [vmem:[#allocation6 + $0xe8] ss:$16 sps:$4 sm:$0xff]  }
  0x49   :  { %1379 = vmatprep.subr.bf16.mxu1 %v2578_v35  ;;  %1354 = vmatprep.mubr.bf16.mxu0 %v3081_v0  ;;  %v2620_v14 = vld [vmem:[#allocation6 + $0x304] ss:$16 sps:$4 sm:$0xff]   ;;  %v2622_v17 = vld [vmem:[#allocation6 + $0x100] ss:$16 sps:$4 sm:$0xff]   ;;  %v2685_v2 = vld [vmem:[#allocation6 + $0x1ec] ss:$16 sps:$4 sm:$0xff]  }
  0x4a   :  { %1395 = vmatprep.mubr.bf16.mxu1 %v3083_v6  ;;  %v2623_v18 = vld [vmem:[#allocation6 + $0x300] ss:$16 sps:$4 sm:$0xff]   ;;  %v2627_v19 = vld [vmem:[#allocation6 + $0x4e4] ss:$16 sps:$4 sm:$0xff]  }
  0x4b   :  { %1339 = vmatpush2.bf16.msra.mxu0 %v2580_v36  ;;  %v2630_v20 = vld [vmem:[#allocation6 + $0x604] ss:$16 sps:$4 sm:$0xff]   ;;  %v2625_v25 = vld [vmem:[#allocation6 + $0x4e0] ss:$16 sps:$4 sm:$0xff]   ;;  %v2643_v36 = vld [vmem:[#allocation6 + $0xcc] ss:$16 sps:$4 sm:$0xff]  }
  0x4c   :  { %1380 = vmatpush2.bf16.msra.mxu1 %v2581_v37  ;;  %1340 = vmatprep.subr.bf16.mxu0 %v2582_v41  ;;  %v2628_v26 = vld [vmem:[#allocation6 + $0x600] ss:$16 sps:$4 sm:$0xff]   ;;  %v2633_v27 = vld [vmem:[#allocation6 + $0x4c4] ss:$16 sps:$4 sm:$0xff]  }
  0x4d   :  { %1381 = vmatprep.subr.bf16.mxu1 %v2584_v42  ;;  %v2631_v31 = vld [vmem:[#allocation6 + $0x4c0] ss:$16 sps:$4 sm:$0xff]   ;;  %v2639_v32 = vld [vmem:[#allocation6 + $0x4a4] ss:$16 sps:$4 sm:$0xff]   ;;  %v2647_v42 = vld [vmem:[#allocation6 + $0xa8] ss:$16 sps:$4 sm:$0xff]  }
  0x4e   :  { %v2637_v35 = vld [vmem:[#allocation6 + $0x4a0] ss:$16 sps:$4 sm:$0xff]   ;;  %v2646_v37 = vld [vmem:[#allocation6 + $0x484] ss:$16 sps:$4 sm:$0xff]  }
  0x4f   :  { %1341 = vmatpush2.bf16.msra.mxu0 %v2586_v43  ;;  %v2644_v39 = vld [vmem:[#allocation6 + $0x480] ss:$16 sps:$4 sm:$0xff]   ;;  %v2652_v41 = vld [vmem:[#allocation6 + $0x464] ss:$16 sps:$4 sm:$0xff]  }
  0x50   :  { %1382 = vmatpush2.bf16.msra.mxu1 %v2587_v46  ;;  %1342 = vmatprep.subr.bf16.mxu0 %v2588_v47  ;;  %v2650_v43 = vld [vmem:[#allocation6 + $0x460] ss:$16 sps:$4 sm:$0xff]   ;;  %v2658_v46 = vld [vmem:[#allocation6 + $0x444] ss:$16 sps:$4 sm:$0xff]   ;;  %v2653_v47 = vld [vmem:[#allocation6 + $0x88] ss:$16 sps:$4 sm:$0xff]  }
  0x51   :  { %1383 = vmatprep.subr.bf16.mxu1 %v2590_v48  ;;  %v2656_v48 = vld [vmem:[#allocation6 + $0x440] ss:$16 sps:$4 sm:$0xff]   ;;  %v2670_v54 = vld [vmem:[#allocation6 + $0x404] ss:$16 sps:$4 sm:$0xff]  }
  0x52   :  { %v2668_v56 = vld [vmem:[#allocation6 + $0x400] ss:$16 sps:$4 sm:$0xff]   ;;  %v2682_v62 = vld [vmem:[#allocation6 + $0x5c4] ss:$16 sps:$4 sm:$0xff]  }
  0x53   :  { %1343 = vmatpush2.bf16.msra.mxu0 %v2592_v49  ;;  %v2661_v49 = vld [vmem:[#allocation6 + $0x6c] ss:$16 sps:$4 sm:$0xff]   ;;  %v2712_v21 = vld [vmem:[#allocation6 + $0x524] ss:$16 sps:$4 sm:$0xff]   ;;  %v2716_v30 = vld [vmem:[#allocation6 + $0x500] ss:$16 sps:$4 sm:$0xff]  }
  0x54   :  { %1384 = vmatpush2.bf16.msra.mxu1 %v2593_v50  ;;  %1344 = vmatprep.subr.bf16.mxu0 %v2594_v52  ;;  %v2664_v50 = vld [vmem:[#allocation6 + $0x424] ss:$16 sps:$4 sm:$0xff]   ;;  %v2662_v52 = vld [vmem:[#allocation6 + $0x420] ss:$16 sps:$4 sm:$0xff]  }
  0x55   :  { %1385 = vmatprep.subr.bf16.mxu1 %v2596_v53  ;;  %v2667_v53 = vld [vmem:[#allocation6 + $0x4c] ss:$16 sps:$4 sm:$0xff]  }
  0x57   :  { %1345 = vmatpush2.bf16.msra.mxu0 %v2598_v55  ;;  %v2665_v55 = vld [vmem:[#allocation6 + $0x48] ss:$16 sps:$4 sm:$0xff]  }
  0x58   :  { %1386 = vmatpush2.bf16.msra.mxu1 %v2599_v58  ;;  %1346 = vmatprep.subr.bf16.mxu0 %v2600_v59  ;;  %v2676_v58 = vld [vmem:[#allocation6 + $0x5e4] ss:$16 sps:$4 sm:$0xff]   ;;  %v2671_v59 = vld [vmem:[#allocation6 + $0x28] ss:$16 sps:$4 sm:$0xff]  }
  0x59   :  { %1387 = vmatprep.subr.bf16.mxu1 %v2602_v60  ;;  %v2674_v60 = vld [vmem:[#allocation6 + $0x5e0] ss:$16 sps:$4 sm:$0xff]  }
  0x5b   :  { %1347 = vmatpush2.bf16.msra.mxu0 %v2604_v63  ;;  %v2677_v63 = vld [vmem:[#allocation6 + $0x8] ss:$16 sps:$4 sm:$0xff]  }
  0x5c   :  { %1388 = vmatpush2.bf16.msra.mxu1 %v2605_v3  ;;  %1348 = vmatprep.subr.bf16.mxu0 %v2606_v4  ;;  %v2688_v3 = vld [vmem:[#allocation6 + $0x5a4] ss:$16 sps:$4 sm:$0xff]   ;;  %v2683_v4 = vld [vmem:[#allocation6 + $0x1e8] ss:$16 sps:$4 sm:$0xff]  }
  0x5d   :  { %1389 = vmatprep.subr.bf16.mxu1 %v2608_v5  ;;  %v2686_v5 = vld [vmem:[#allocation6 + $0x5a0] ss:$16 sps:$4 sm:$0xff]  }
  0x5f   :  { %1349 = vmatpush2.bf16.msra.mxu0 %v2610_v7  ;;  %v2691_v7 = vld [vmem:[#allocation6 + $0x1cc] ss:$16 sps:$4 sm:$0xff]  }
  0x60   :  { %1390 = vmatpush2.bf16.msra.mxu1 %v2611_v8  ;;  %1350 = vmatprep.subr.bf16.mxu0 %v2612_v9  ;;  %v2694_v8 = vld [vmem:[#allocation6 + $0x584] ss:$16 sps:$4 sm:$0xff]   ;;  %v2689_v9 = vld [vmem:[#allocation6 + $0x1c8] ss:$16 sps:$4 sm:$0xff]  }
  0x61   :  { %1391 = vmatprep.subr.bf16.mxu1 %v2614_v10  ;;  %v2692_v10 = vld [vmem:[#allocation6 + $0x580] ss:$16 sps:$4 sm:$0xff]  }
  0x63   :  { %1351 = vmatpush2.bf16.msra.mxu0 %v2616_v11  ;;  %v2697_v11 = vld [vmem:[#allocation6 + $0x1ac] ss:$16 sps:$4 sm:$0xff]  }
  0x64   :  { %1392 = vmatpush2.bf16.msra.mxu1 %v2617_v12  ;;  %1352 = vmatprep.subr.bf16.mxu0 %v2618_v13  ;;  %v2700_v12 = vld [vmem:[#allocation6 + $0x564] ss:$16 sps:$4 sm:$0xff]   ;;  %v2695_v13 = vld [vmem:[#allocation6 + $0x1a8] ss:$16 sps:$4 sm:$0xff]  }
  0x65   :  { %1393 = vmatprep.subr.bf16.mxu1 %v2620_v14  ;;  %v2698_v14 = vld [vmem:[#allocation6 + $0x560] ss:$16 sps:$4 sm:$0xff]  }
  0x67   :  { %1353 = vmatpush2.bf16.msra.mxu0 %v2622_v17  ;;  %v2706_v17 = vld [vmem:[#allocation6 + $0x544] ss:$16 sps:$4 sm:$0xff]  }
  0x68   :  { %1394 = vmatpush2.bf16.msra.mxu1 %v2623_v18  ;;  %1404 = vmatprep.subr.bf16.mxu0 %v2627_v19  ;;  %v2701_v18 = vld [vmem:[#allocation6 + $0x188] ss:$16 sps:$4 sm:$0xff]   ;;  %v2704_v19 = vld [vmem:[#allocation6 + $0x540] ss:$16 sps:$4 sm:$0xff]  }
  0x69   :  { %1459 = vmatprep.subr.bf16.mxu1 %v2630_v20  ;;  %v2709_v20 = vld [vmem:[#allocation6 + $0x16c] ss:$16 sps:$4 sm:$0xff]  }
  0x6a   :  { %1355 = vmatmul.mubr.bf16.vlgmr.msra.gmra.mxu0 %v3092_v22 }
  0x6b   :  { %1396 = vmatmul.mubr.bf16.vlgmr.msra.gmra.mxu1 %v3094_v23  ;;  %1405 = vmatpush1.bf16.msra.mxu0 %v2625_v25  ;;  %v2710_v25 = vld [vmem:[#allocation6 + $0x520] ss:$16 sps:$4 sm:$0xff]  }
  0x6c   :  { %1460 = vmatpush1.bf16.msra.mxu1 %v2628_v26  ;;  %1406 = vmatprep.subr.bf16.mxu0 %v2633_v27  ;;  %v2715_v26 = vld [vmem:[#allocation6 + $0x14c] ss:$16 sps:$4 sm:$0xff]   ;;  %v2718_v27 = vld [vmem:[#allocation6 + $0x504] ss:$16 sps:$4 sm:$0xff]  }
  0x6d   :  { %1477 = vmatprep.mubr.bf16.mxu1 %v3017_v1  ;;  %1486 = vmatprep.subr.bf16.mxu1 %v2636_v28  ;;  %v2713_v28 = vld [vmem:[#allocation6 + $0x148] ss:$16 sps:$4 sm:$0xff]  }
  0x6e   :  { %1436 = vmatprep.mubr.bf16.mxu0 %v3096_v29 }
  0x6f   :  { %1407 = vmatpush1.bf16.msra.mxu0 %v2631_v31  ;;  %v2721_v31 = vld [vmem:[#allocation6 + $0x12c] ss:$16 sps:$4 sm:$0xff]  }
  0x70   :  { %1408 = vmatprep.subr.bf16.mxu0 %v2639_v32  ;;  %v2724_v32 = vld [vmem:[#allocation6 + $0x2ec] ss:$16 sps:$4 sm:$0xff]  }
  0x73   :  { %2448 = vmatmul.mubr.msk.bf16.vlgmr.msra.gmra.mxu1 %vm1318_vm0, %v3103_v33  ;;  %1409 = vmatpush1.bf16.msra.mxu0 %v2637_v35  ;;  %v2719_v35 = vld [vmem:[#allocation6 + $0x128] ss:$16 sps:$4 sm:$0xff]  }
  0x74   :  { %1487 = vmatpush1.bf16.msra.mxu1 %v2634_v34  ;;  %1410 = vmatprep.subr.bf16.mxu0 %v2646_v37  ;;  %v3110_v34 = vpack.c.bf16 %v3088_v16, %v3088_v16  ;;  %v2727_v37 = vld [vmem:[#allocation6 + $0x10c] ss:$16 sps:$4 sm:$0xff]   ;;  %v2731_v16 = vld [vmem:[#allocation6 + $0x4e8] ss:$16 sps:$4 sm:$0xff]  }
  0x75   :  { %1488 = vmatprep.subr.bf16.mxu1 %v2643_v36  ;;  %1518 = vmatprep.mubr.bf16.mxu1 %v3081_v0  ;;  %v2680_v0 = vld [vmem:[#allocation6 + $0x5c0] ss:$16 sps:$4 sm:$0xff]   ;;  %v2722_v36 = vld [vmem:[#allocation6 + $0x2e8] ss:$16 sps:$4 sm:$0xff]  }
  0x77   :  { %1411 = vmatpush1.bf16.msra.mxu0 %v2644_v39  ;;  %v2725_v39 = vld [vmem:[#allocation6 + $0x108] ss:$16 sps:$4 sm:$0xff]  }
  0x78   :  { %1489 = vmatpush1.bf16.msra.mxu1 %v2641_v38  ;;  %1412 = vmatprep.subr.bf16.mxu0 %v2652_v41  ;;  %v2730_v38 = vld [vmem:[#allocation6 + $0x2cc] ss:$16 sps:$4 sm:$0xff]  }
  0x79   :  { %1490 = vmatprep.subr.bf16.mxu1 %v2649_v40  ;;  %v2728_v40 = vld [vmem:[#allocation6 + $0x2c8] ss:$16 sps:$4 sm:$0xff]   ;;  %v2733_v41 = vld [vmem:[#allocation6 + $0x4ec] ss:$16 sps:$4 sm:$0xff]  }
  0x7b   :  { %1413 = vmatpush1.bf16.msra.mxu0 %v2650_v43  ;;  %v2734_v43 = vld [vmem:[#allocation6 + $0x2a8] ss:$16 sps:$4 sm:$0xff]  }
  0x7c   :  { %1491 = vmatpush1.bf16.msra.mxu1 %v2647_v42  ;;  %1414 = vmatprep.subr.bf16.mxu0 %v2658_v46  ;;  %v2736_v42 = vld [vmem:[#allocation6 + $0x2ac] ss:$16 sps:$4 sm:$0xff]  }
  0x7d   :  { %1492 = vmatprep.subr.bf16.mxu1 %v2655_v44  ;;  %v2739_v44 = vld [vmem:[#allocation6 + $0x4cc] ss:$16 sps:$4 sm:$0xff]  }
  0x7e   :  { %v2742_v46 = vld [vmem:[#allocation6 + $0x28c] ss:$16 sps:$4 sm:$0xff]  }
  0x7f   :  { %1415 = vmatpush1.bf16.msra.mxu0 %v2656_v48  ;;  %v2740_v48 = vld [vmem:[#allocation6 + $0x288] ss:$16 sps:$4 sm:$0xff]  }
  0x80   :  { %1493 = vmatpush1.bf16.msra.mxu1 %v2653_v47  ;;  %1416 = vmatprep.subr.bf16.mxu0 %v2664_v50  ;;  %v2737_v47 = vld [vmem:[#allocation6 + $0x4c8] ss:$16 sps:$4 sm:$0xff]   ;;  %v2748_v50 = vld [vmem:[#allocation6 + $0x26c] ss:$16 sps:$4 sm:$0xff]  }
  0x81   :  { %1494 = vmatprep.subr.bf16.mxu1 %v2661_v49  ;;  %v2745_v49 = vld [vmem:[#allocation6 + $0x4ac] ss:$16 sps:$4 sm:$0xff]  }
  0x83   :  { %1417 = vmatpush1.bf16.msra.mxu0 %v2662_v52  ;;  %v2751_v52 = vld [vmem:[#allocation6 + $0x48c] ss:$16 sps:$4 sm:$0xff]  }
  0x84   :  { %1495 = vmatpush1.bf16.msra.mxu1 %v2659_v51  ;;  %1418 = vmatprep.subr.bf16.mxu0 %v2670_v54  ;;  %v2743_v51 = vld [vmem:[#allocation6 + $0x4a8] ss:$16 sps:$4 sm:$0xff]  }
  0x85   :  { %1496 = vmatprep.subr.bf16.mxu1 %v2667_v53  ;;  %v2754_v53 = vld [vmem:[#allocation6 + $0x24c] ss:$16 sps:$4 sm:$0xff]   ;;  %v2749_v54 = vld [vmem:[#allocation6 + $0x488] ss:$16 sps:$4 sm:$0xff]  }
  0x87   :  { %1419 = vmatpush1.bf16.msra.mxu0 %v2668_v56  ;;  %v2760_v56 = vld [vmem:[#allocation6 + $0x22c] ss:$16 sps:$4 sm:$0xff]  }
  0x88   :  { %1497 = vmatpush1.bf16.msra.mxu1 %v2665_v55  ;;  %1420 = vmatprep.subr.bf16.mxu0 %v2676_v58  ;;  %v2757_v55 = vld [vmem:[#allocation6 + $0x46c] ss:$16 sps:$4 sm:$0xff]  }
  0x89   :  { %1498 = vmatprep.subr.bf16.mxu1 %v2673_v57  ;;  %v2755_v57 = vld [vmem:[#allocation6 + $0x468] ss:$16 sps:$4 sm:$0xff]   ;;  %v2763_v58 = vld [vmem:[#allocation6 + $0x44c] ss:$16 sps:$4 sm:$0xff]  }
  0x8b   :  { %1421 = vmatpush2.bf16.msra.mxu0 %v2674_v60  ;;  %v2761_v60 = vld [vmem:[#allocation6 + $0x448] ss:$16 sps:$4 sm:$0xff]  }
  0x8c   :  { %1499 = vmatpush1.bf16.msra.mxu1 %v2671_v59  ;;  %1422 = vmatprep.subr.bf16.mxu0 %v2682_v62  ;;  %v2766_v59 = vld [vmem:[#allocation6 + $0x20c] ss:$16 sps:$4 sm:$0xff]  }
  0x8d   :  { %1500 = vmatprep.subr.bf16.mxu1 %v2679_v61  ;;  %v2764_v61 = vld [vmem:[#allocation6 + $0x208] ss:$16 sps:$4 sm:$0xff]   ;;  %v2769_v62 = vld [vmem:[#allocation6 + $0x42c] ss:$16 sps:$4 sm:$0xff]  }
  0x8f   :  { %1423 = vmatpush2.bf16.msra.mxu0 %v2680_v0  ;;  %v2767_v0 = vld [vmem:[#allocation6 + $0x428] ss:$16 sps:$4 sm:$0xff]  }
  0x90   :  { %1501 = vmatpush1.bf16.msra.mxu1 %v2677_v63  ;;  %1424 = vmatprep.subr.bf16.mxu0 %v2688_v3  ;;  %v2772_v63 = vld [vmem:[#allocation6 + $0x3ec] ss:$16 sps:$4 sm:$0xff]  }
  0x91   :  { %1502 = vmatprep.subr.bf16.mxu1 %v2685_v2  ;;  %v2770_v2 = vld [vmem:[#allocation6 + $0x3e8] ss:$16 sps:$4 sm:$0xff]   ;;  %v2775_v3 = vld [vmem:[#allocation6 + $0x40c] ss:$16 sps:$4 sm:$0xff]  }
  0x93   :  { %1425 = vmatpush2.bf16.msra.mxu0 %v2686_v5  ;;  %v2773_v5 = vld [vmem:[#allocation6 + $0x408] ss:$16 sps:$4 sm:$0xff]  }
  0x94   :  { %1503 = vmatpush2.bf16.msra.mxu1 %v2683_v4  ;;  %1426 = vmatprep.subr.bf16.mxu0 %v2694_v8  ;;  %v2778_v4 = vld [vmem:[#allocation6 + $0x3cc] ss:$16 sps:$4 sm:$0xff]  }
  0x95   :  { %1504 = vmatprep.subr.bf16.mxu1 %v2691_v7  ;;  %v2776_v7 = vld [vmem:[#allocation6 + $0x3c8] ss:$16 sps:$4 sm:$0xff]   ;;  %v2781_v8 = vld [vmem:[#allocation6 + $0x5ec] ss:$16 sps:$4 sm:$0xff]  }
  0x97   :  { %1427 = vmatpush2.bf16.msra.mxu0 %v2692_v10  ;;  %v2779_v10 = vld [vmem:[#allocation6 + $0x5e8] ss:$16 sps:$4 sm:$0xff]  }
  0x98   :  { %1505 = vmatpush2.bf16.msra.mxu1 %v2689_v9  ;;  %1428 = vmatprep.subr.bf16.mxu0 %v2700_v12  ;;  %v2784_v9 = vld [vmem:[#allocation6 + $0x3ac] ss:$16 sps:$4 sm:$0xff]  }
  0x99   :  { %1506 = vmatprep.subr.bf16.mxu1 %v2697_v11  ;;  %v2782_v11 = vld [vmem:[#allocation6 + $0x3a8] ss:$16 sps:$4 sm:$0xff]   ;;  %v2787_v12 = vld [vmem:[#allocation6 + $0x5cc] ss:$16 sps:$4 sm:$0xff]  }
  0x9b   :  { %1429 = vmatpush2.bf16.msra.mxu0 %v2698_v14  ;;  %v2785_v14 = vld [vmem:[#allocation6 + $0x5c8] ss:$16 sps:$4 sm:$0xff]  }
  0x9c   :  { %1507 = vmatpush2.bf16.msra.mxu1 %v2695_v13  ;;  %1430 = vmatprep.subr.bf16.mxu0 %v2706_v17  ;;  %v2790_v13 = vld [vmem:[#allocation6 + $0x38c] ss:$16 sps:$4 sm:$0xff]  }
  0x9d   :  { %1508 = vmatprep.subr.bf16.mxu1 %v2703_v15  ;;  %v2788_v15 = vld [vmem:[#allocation6 + $0x388] ss:$16 sps:$4 sm:$0xff]   ;;  %v2793_v17 = vld [vmem:[#allocation6 + $0x5ac] ss:$16 sps:$4 sm:$0xff]  }
  0x9f   :  { %1431 = vmatpush2.bf16.msra.mxu0 %v2704_v19  ;;  %v2791_v19 = vld [vmem:[#allocation6 + $0x5a8] ss:$16 sps:$4 sm:$0xff]  }
  0xa0   :  { %1509 = vmatpush2.bf16.msra.mxu1 %v2701_v18  ;;  %1432 = vmatprep.subr.bf16.mxu0 %v2712_v21  ;;  %v2796_v18 = vld [vmem:[#allocation6 + $0x36c] ss:$16 sps:$4 sm:$0xff]  }
  0xa1   :  { %1510 = vmatprep.subr.bf16.mxu1 %v2709_v20  ;;  %v2794_v20 = vld [vmem:[#allocation6 + $0x368] ss:$16 sps:$4 sm:$0xff]   ;;  %v2799_v21 = vld [vmem:[#allocation6 + $0x58c] ss:$16 sps:$4 sm:$0xff]  }
  0xa3   :  { %1433 = vmatpush2.bf16.msra.mxu0 %v2710_v25  ;;  %v2797_v25 = vld [vmem:[#allocation6 + $0x588] ss:$16 sps:$4 sm:$0xff]  }
  0xa4   :  { %1511 = vmatpush2.bf16.msra.mxu1 %v2707_v24  ;;  %1434 = vmatprep.subr.bf16.mxu0 %v2718_v27  ;;  %v2802_v24 = vld [vmem:[#allocation6 + $0x34c] ss:$16 sps:$4 sm:$0xff]  }
  0xa5   :  { %1512 = vmatprep.subr.bf16.mxu1 %v2715_v26  ;;  %v2800_v26 = vld [vmem:[#allocation6 + $0x348] ss:$16 sps:$4 sm:$0xff]   ;;  %v2805_v27 = vld [vmem:[#allocation6 + $0x56c] ss:$16 sps:$4 sm:$0xff]  }
  0xa7   :  { %1435 = vmatpush2.bf16.msra.mxu0 %v2716_v30  ;;  %v2803_v30 = vld [vmem:[#allocation6 + $0x568] ss:$16 sps:$4 sm:$0xff]  }
  0xa8   :  { %1513 = vmatpush2.bf16.msra.mxu1 %v2713_v28  ;;  %1527 = vmatprep.subr.bf16.mxu0 %v2724_v32  ;;  %v2808_v28 = vld [vmem:[#allocation6 + $0x32c] ss:$16 sps:$4 sm:$0xff]  }
  0xa9   :  { %1514 = vmatprep.subr.bf16.mxu1 %v2721_v31  ;;  %v2806_v31 = vld [vmem:[#allocation6 + $0x328] ss:$16 sps:$4 sm:$0xff]   ;;  %v2811_v32 = vld [vmem:[#allocation6 + $0x54c] ss:$16 sps:$4 sm:$0xff]  }
  0xaa   :  { %1437 = vmatmul.mubr.bf16.vlgmr.msra.gmra.mxu0 %v3110_v34 }
  0xab   :  { %1528 = vmatpush1.bf16.msra.mxu0 %v2722_v36  ;;  %1559 = vmatprep.mubr.bf16.mxu0 %v3083_v6  ;;  %v2746_v6 = vld [vmem:[#allocation6 + $0x268] ss:$16 sps:$4 sm:$0xff]  }
  0xac   :  { %1515 = vmatpush2.bf16.msra.mxu1 %v2719_v35  ;;  %1529 = vmatprep.subr.bf16.mxu0 %v2730_v38  ;;  %v2814_v35 = vld [vmem:[#allocation6 + $0x30c] ss:$16 sps:$4 sm:$0xff]   ;;  %v2809_v36 = vld [vmem:[#allocation6 + $0x548] ss:$16 sps:$4 sm:$0xff]  }
  0xad   :  { %1516 = vmatprep.subr.bf16.mxu1 %v2727_v37  ;;  %v2812_v37 = vld [vmem:[#allocation6 + $0x308] ss:$16 sps:$4 sm:$0xff]   ;;  %v2817_v38 = vld [vmem:[#allocation6 + $0x52c] ss:$16 sps:$4 sm:$0xff]  }
  0xaf   :  { %1530 = vmatpush1.bf16.msra.mxu0 %v2728_v40  ;;  %v2815_v40 = vld [vmem:[#allocation6 + $0x528] ss:$16 sps:$4 sm:$0xff]  }
  0xb0   :  { %1517 = vmatpush2.bf16.msra.mxu1 %v2725_v39  ;;  %1531 = vmatprep.subr.bf16.mxu0 %v2736_v42  ;;  %v2820_v39 = vld [vmem:[#allocation6 + $0x60c] ss:$16 sps:$4 sm:$0xff]  }
  0xb1   :  { %1568 = vmatprep.subr.bf16.mxu1 %v2733_v41  ;;  %v2818_v41 = vld [vmem:[#allocation6 + $0x608] ss:$16 sps:$4 sm:$0xff]   ;;  %v2823_v42 = vld [vmem:[#allocation6 + $0x50c] ss:$16 sps:$4 sm:$0xff]  }
  0xb3   :  { %1519 = vmatmul.mubr.bf16.vlgmr.msra.gmra.mxu1 %v3092_v22  ;;  %1532 = vmatpush1.bf16.msra.mxu0 %v2734_v43  ;;  %v2752_v22 = vld [vmem:[#allocation6 + $0x248] ss:$16 sps:$4 sm:$0xff]  }
  0xb4   :  { %1569 = vmatpush1.bf16.msra.mxu1 %v2731_v16  ;;  %1533 = vmatprep.subr.bf16.mxu0 %v2742_v46  ;;  %v2826_v16 = vld [vmem:[#allocation8 + $0x74] ss:$8 sps:$4 sm:$0xff]   ;;  %v2821_v43 = vld [vmem:[#allocation6 + $0x508] ss:$16 sps:$4 sm:$0xff]   ;;  %v2829_v46 = vld [vmem:[#allocation8 + $0x64] ss:$8 sps:$4 sm:$0xff]  }
  0xb5   :  { %1570 = vmatprep.subr.bf16.mxu1 %v2739_v44  ;;  %1600 = vmatprep.mubr.bf16.mxu1 %v3096_v29  ;;  %v2758_v29 = vld [vmem:[#allocation6 + $0x228] ss:$16 sps:$4 sm:$0xff]  }
  0xb6   :  { %v2824_v44 = vld [vmem:[#allocation8 + $0x70] ss:$8 sps:$4 sm:$0xff]  }
  0xb7   :  { %1534 = vmatpush1.bf16.msra.mxu0 %v2740_v48  ;;  %v2832_v48 = vld [vmem:[#allocation8 + $0x54] ss:$8 sps:$4 sm:$0xff]  }
  0xb8   :  { %1571 = vmatpush1.bf16.msra.mxu1 %v2737_v47  ;;  %1535 = vmatprep.subr.bf16.mxu0 %v2748_v50  ;;  %v2827_v47 = vld [vmem:[#allocation8 + $0x60] ss:$8 sps:$4 sm:$0xff]   ;;  %v2872_v50 = vld [vmem:[#allocation8 + $0x170] ss:$8 sps:$4 sm:$0xff]  }
  0xb9   :  { %1572 = vmatprep.subr.bf16.mxu1 %v2745_v49  ;;  %v2835_v49 = vld [vmem:[#allocation8 + $0x44] ss:$8 sps:$4 sm:$0xff]  }
  0xbb   :  { %1536 = vmatpush1.bf16.msra.mxu0 %v2746_v6  ;;  %v2833_v6 = vld [vmem:[#allocation8 + $0x40] ss:$8 sps:$4 sm:$0xff]  }
  0xbc   :  { %1573 = vmatpush1.bf16.msra.mxu1 %v2743_v51  ;;  %1537 = vmatprep.subr.bf16.mxu0 %v2754_v53  ;;  %v2874_v51 = vld [vmem:[#allocation8 + $0x174] ss:$8 sps:$4 sm:$0xff]   ;;  %v2836_v53 = vld [vmem:[#allocation8 + $0x30] ss:$8 sps:$4 sm:$0xff]  }
  0xbd   :  { %1574 = vmatprep.subr.bf16.mxu1 %v2751_v52  ;;  %v2875_v52 = vld [vmem:[#allocation8 + $0x160] ss:$8 sps:$4 sm:$0xff]  }
  0xbf   :  { %1538 = vmatpush1.bf16.msra.mxu0 %v2752_v22  ;;  %v2841_v22 = vld [vmem:[#allocation8 + $0x24] ss:$8 sps:$4 sm:$0xff]  }
  0xc0   :  { %1575 = vmatpush1.bf16.msra.mxu1 %v2749_v54  ;;  %1539 = vmatprep.subr.bf16.mxu0 %v2760_v56  ;;  %v2878_v54 = vld [vmem:[#allocation8 + $0x150] ss:$8 sps:$4 sm:$0xff]   ;;  %v2839_v56 = vld [vmem:[#allocation8 + $0x20] ss:$8 sps:$4 sm:$0xff]  }
  0xc1   :  { %1576 = vmatprep.subr.bf16.mxu1 %v2757_v55  ;;  %v2883_v55 = vld [vmem:[#allocation8 + $0x144] ss:$8 sps:$4 sm:$0xff]  }
  0xc3   :  { %1540 = vmatpush1.bf16.msra.mxu0 %v2758_v29  ;;  %v2844_v29 = vld [vmem:[#allocation8 + $0x14] ss:$8 sps:$4 sm:$0xff]  }
  0xc4   :  { %1577 = vmatpush1.bf16.msra.mxu1 %v2755_v57  ;;  %1541 = vmatprep.subr.bf16.mxu0 %v2766_v59  ;;  %v2881_v57 = vld [vmem:[#allocation8 + $0x140] ss:$8 sps:$4 sm:$0xff]   ;;  %v2842_v59 = vld [vmem:[#allocation8 + $0x10] ss:$8 sps:$4 sm:$0xff]  }
  0xc5   :  { %1578 = vmatprep.subr.bf16.mxu1 %v2763_v58  ;;  %v2886_v58 = vld [vmem:[#allocation8 + $0x134] ss:$8 sps:$4 sm:$0xff]  }
  0xc7   :  { %1542 = vmatpush1.bf16.msra.mxu0 %v2764_v61  ;;  %v2847_v61 = vld [vmem:[#allocation8 + $0x4] ss:$8 sps:$4 sm:$0xff]  }
  0xc8   :  { %1579 = vmatpush1.bf16.msra.mxu1 %v2761_v60  ;;  %1543 = vmatprep.subr.bf16.mxu0 %v2772_v63  ;;  %v2884_v60 = vld [vmem:[#allocation8 + $0x130] ss:$8 sps:$4 sm:$0xff]   ;;  %v2845_v63 = vld [vmem:[#allocation8] ss:$8 sps:$4 sm:$0xff]  }
  0xc9   :  { %1580 = vmatprep.subr.bf16.mxu1 %v2769_v62  ;;  %v2889_v62 = vld [vmem:[#allocation8 + $0x124] ss:$8 sps:$4 sm:$0xff]  }
  0xcb   :  { %1544 = vmatpush2.bf16.msra.mxu0 %v2770_v2  ;;  %v2850_v2 = vld [vmem:[#allocation8 + $0xf4] ss:$8 sps:$4 sm:$0xff]  }
  0xcc   :  { %1581 = vmatpush1.bf16.msra.mxu1 %v2767_v0  ;;  %1545 = vmatprep.subr.bf16.mxu0 %v2778_v4  ;;  %v2887_v0 = vld [vmem:[#allocation8 + $0x120] ss:$8 sps:$4 sm:$0xff]   ;;  %v2848_v4 = vld [vmem:[#allocation8 + $0xf0] ss:$8 sps:$4 sm:$0xff]  }
  0xcd   :  { %1582 = vmatprep.subr.bf16.mxu1 %v2775_v3  ;;  %v2892_v3 = vld [vmem:[#allocation8 + $0x114] ss:$8 sps:$4 sm:$0xff]  }
  0xcf   :  { %1546 = vmatpush2.bf16.msra.mxu0 %v2776_v7  ;;  %v2853_v7 = vld [vmem:[#allocation8 + $0xe4] ss:$8 sps:$4 sm:$0xff]  }
  0xd0   :  { %1583 = vmatpush1.bf16.msra.mxu1 %v2773_v5  ;;  %1547 = vmatprep.subr.bf16.mxu0 %v2784_v9  ;;  %v2890_v5 = vld [vmem:[#allocation8 + $0x110] ss:$8 sps:$4 sm:$0xff]   ;;  %v2851_v9 = vld [vmem:[#allocation8 + $0xe0] ss:$8 sps:$4 sm:$0xff]  }
  0xd1   :  { %1584 = vmatprep.subr.bf16.mxu1 %v2781_v8  ;;  %v2895_v8 = vld [vmem:[#allocation8 + $0x104] ss:$8 sps:$4 sm:$0xff]  }
  0xd3   :  { %1548 = vmatpush2.bf16.msra.mxu0 %v2782_v11  ;;  %v2856_v11 = vld [vmem:[#allocation8 + $0xd4] ss:$8 sps:$4 sm:$0xff]  }
  0xd4   :  { %1585 = vmatpush2.bf16.msra.mxu1 %v2779_v10  ;;  %1549 = vmatprep.subr.bf16.mxu0 %v2790_v13  ;;  %v2893_v10 = vld [vmem:[#allocation8 + $0x100] ss:$8 sps:$4 sm:$0xff]   ;;  %v2854_v13 = vld [vmem:[#allocation8 + $0xd0] ss:$8 sps:$4 sm:$0xff]  }
  0xd5   :  { %1586 = vmatprep.subr.bf16.mxu1 %v2787_v12  ;;  %v2898_v12 = vld [vmem:[#allocation8 + $0x1f4] ss:$8 sps:$4 sm:$0xff]  }
  0xd7   :  { %1550 = vmatpush2.bf16.msra.mxu0 %v2788_v15  ;;  %v2859_v15 = vld [vmem:[#allocation8 + $0xc4] ss:$8 sps:$4 sm:$0xff]  }
  0xd8   :  { %1587 = vmatpush2.bf16.msra.mxu1 %v2785_v14  ;;  %1551 = vmatprep.subr.bf16.mxu0 %v2796_v18  ;;  %v2896_v14 = vld [vmem:[#allocation8 + $0x1f0] ss:$8 sps:$4 sm:$0xff]   ;;  %v2857_v18 = vld [vmem:[#allocation8 + $0xc0] ss:$8 sps:$4 sm:$0xff]  }
  0xd9   :  { %1588 = vmatprep.subr.bf16.mxu1 %v2793_v17  ;;  %v2901_v17 = vld [vmem:[#allocation8 + $0x1e4] ss:$8 sps:$4 sm:$0xff]  }
  0xdb   :  { %1552 = vmatpush2.bf16.msra.mxu0 %v2794_v20  ;;  %v2862_v20 = vld [vmem:[#allocation8 + $0xb4] ss:$8 sps:$4 sm:$0xff]  }
  0xdc   :  { %1589 = vmatpush2.bf16.msra.mxu1 %v2791_v19  ;;  %1553 = vmatprep.subr.bf16.mxu0 %v2802_v24  ;;  %v2899_v19 = vld [vmem:[#allocation8 + $0x1e0] ss:$8 sps:$4 sm:$0xff]   ;;  %v2860_v24 = vld [vmem:[#allocation8 + $0xb0] ss:$8 sps:$4 sm:$0xff]  }
  0xdd   :  { %1590 = vmatprep.subr.bf16.mxu1 %v2799_v21  ;;  %v2904_v21 = vld [vmem:[#allocation8 + $0x1d4] ss:$8 sps:$4 sm:$0xff]  }
  0xdf   :  { %1554 = vmatpush2.bf16.msra.mxu0 %v2800_v26  ;;  %v2865_v26 = vld [vmem:[#allocation8 + $0xa4] ss:$8 sps:$4 sm:$0xff]  }
  0xe0   :  { %1591 = vmatpush2.bf16.msra.mxu1 %v2797_v25  ;;  %1555 = vmatprep.subr.bf16.mxu0 %v2808_v28  ;;  %v2902_v25 = vld [vmem:[#allocation8 + $0x1d0] ss:$8 sps:$4 sm:$0xff]   ;;  %v2868_v28 = vld [vmem:[#allocation8 + $0x94] ss:$8 sps:$4 sm:$0xff]  }
  0xe1   :  { %1592 = vmatprep.subr.bf16.mxu1 %v2805_v27  ;;  %v2863_v27 = vld [vmem:[#allocation8 + $0xa0] ss:$8 sps:$4 sm:$0xff]  }
  0xe3   :  { %1556 = vmatpush2.bf16.msra.mxu0 %v2806_v31  ;;  %v2871_v31 = vld [vmem:[#allocation8 + $0x84] ss:$8 sps:$4 sm:$0xff]  }
  0xe4   :  { %1593 = vmatpush2.bf16.msra.mxu1 %v2803_v30  ;;  %1557 = vmatprep.subr.bf16.mxu0 %v2814_v35  ;;  %v2866_v30 = vld [vmem:[#allocation8 + $0x90] ss:$8 sps:$4 sm:$0xff]  }
  0xe5   :  { %1594 = vmatprep.subr.bf16.mxu1 %v2811_v32  ;;  %v2907_v32 = vld [vmem:[#allocation8 + $0x1c4] ss:$8 sps:$4 sm:$0xff]  }
  0xe7   :  { %1558 = vmatpush2.bf16.msra.mxu0 %v2812_v37  ;;  %v2905_v37 = vld [vmem:[#allocation8 + $0x1c0] ss:$8 sps:$4 sm:$0xff]  }
  0xe8   :  { %1595 = vmatpush2.bf16.msra.mxu1 %v2809_v36  ;;  %1623 = vmatprep.subr.bf16.mxu0 %v2820_v39 }
  0xe9   :  { %1596 = vmatprep.subr.bf16.mxu1 %v2817_v38  ;;  %v2869_v38 = vld [vmem:[#allocation8 + $0x80] ss:$8 sps:$4 sm:$0xff]  }
  0xea   :  { %1560 = vmatmul.mubr.bf16.vlgmr.msra.gmra.mxu0 %v3094_v23  ;;  %v2830_v23 = vld [vmem:[#allocation8 + $0x50] ss:$8 sps:$4 sm:$0xff]  }
  0xeb   :  { %1624 = vmatpush1.bf16.msra.mxu0 %v2818_v41  ;;  %1641 = vmatprep.mubr.bf16.mxu0 %v3017_v1  ;;  %v2877_v1 = vld [vmem:[#allocation8 + $0x164] ss:$8 sps:$4 sm:$0xff]   ;;  %v2910_v41 = vld [vmem:[#allocation8 + $0x1b4] ss:$8 sps:$4 sm:$0xff]  }
  0xec   :  { %1597 = vmatpush2.bf16.msra.mxu1 %v2815_v40  ;;  %2062 = vmatprep.subr.bf16.mxu0 %v2826_v16 }
  0xed   :  { %1598 = vmatprep.subr.bf16.mxu1 %v2823_v42 }
  0xf0   :  { %1599 = vmatpush2.bf16.msra.mxu1 %v2821_v43  ;;  %v2908_v43 = vld [vmem:[#allocation8 + $0x1b0] ss:$8 sps:$4 sm:$0xff]  }
  0xf1   :  { %2103 = vmatprep.subr.bf16.mxu1 %v2874_v51 }
  0xf2   :  { %2449 = vmatmul.mubr.msk.bf16.vlgmr.msra.gmra.mxu0 %vm1318_vm0, %v3103_v33  ;;  %v2880_v33 = vld [vmem:[#allocation8 + $0x154] ss:$8 sps:$4 sm:$0xff]  }
  0xf3   :  { %1601 = vmatmul.mubr.bf16.vlgmr.msra.gmra.mxu1 %v3110_v34  ;;  %2063 = vmatpush1.bf16.msra.mxu0 %v2824_v44  ;;  %v2838_v34 = vld [vmem:[#allocation8 + $0x34] ss:$8 sps:$4 sm:$0xff]  }
  0xf4   :  { %2064 = vmatprep.subr.bf16.mxu0 %v2829_v46  ;;  %2104 = vmatpush1.bf16.msra.mxu1 %v2872_v50  ;;  %v2916_v50 = vld [vmem:[#allocation8 + $0x194] ss:$8 sps:$4 sm:$0xff]  }
  0xf5   :  { %2105 = vmatprep.subr.bf16.mxu1 %v2877_v1  ;;  %v2914_v1 = vld [vmem:[#allocation8 + $0x190] ss:$8 sps:$4 sm:$0xff]  }
  0xf7   :  { %2065 = vmatpush1.bf16.msra.mxu0 %v2827_v47  ;;  %v2913_v47 = vld [vmem:[#allocation8 + $0x1a4] ss:$8 sps:$4 sm:$0xff]  }
  0xf8   :  { %2066 = vmatprep.subr.bf16.mxu0 %v2832_v48  ;;  %2106 = vmatpush1.bf16.msra.mxu1 %v2875_v52  ;;  %v2919_v52 = vld [vmem:[#allocation8 + $0x184] ss:$8 sps:$4 sm:$0xff]  }
  0xf9   :  { %2107 = vmatprep.subr.bf16.mxu1 %v2880_v33  ;;  %v3122_v33 = vsub.s32 0, %v3074_v45 }
  0xfb   :  { %2067 = vmatpush1.bf16.msra.mxu0 %v2830_v23  ;;  %v2911_v23 = vld [vmem:[#allocation8 + $0x1a0] ss:$8 sps:$4 sm:$0xff]  }
  0xfc   :  { %2068 = vmatprep.subr.bf16.mxu0 %v2835_v49  ;;  %2108 = vmatpush1.bf16.msra.mxu1 %v2878_v54  ;;  %v324_v54 = vsub.s32 1, %v3074_v45 }
  0xfd   :  { %2109 = vmatprep.subr.bf16.mxu1 %v2883_v55 }
  0xff   :  { %2069 = vmatpush1.bf16.msra.mxu0 %v2833_v6 }
 0x100   :  { %2070 = vmatprep.subr.bf16.mxu0 %v2838_v34  ;;  %2110 = vmatpush1.bf16.msra.mxu1 %v2881_v57  ;;  %v2917_v34 = vld [vmem:[#allocation8 + $0x180] ss:$8 sps:$4 sm:$0xff]  }
 0x101   :  { %2111 = vmatprep.subr.bf16.mxu1 %v2886_v58 }
 0x103   :  { %2071 = vmatpush1.bf16.msra.mxu0 %v2836_v53  ;;  %v316_v53 = vld [vmem:[%s3149_s2] sm:$0xf] }
 0x104   :  { %2072 = vmatprep.subr.bf16.mxu0 %v2841_v22  ;;  %2112 = vmatpush1.bf16.msra.mxu1 %v2884_v60  ;;  %v321_v22 = vrot.slane %v316_v53, %v3122_v33  ;;  %v325_v55 = vrot.slane %v316_v53, %v324_v54 }
 0x105   :  { %2113 = vmatprep.subr.bf16.mxu1 %v2889_v62 }
 0x107   :  { %2073 = vmatpush1.bf16.msra.mxu0 %v2839_v56 }
 0x108   :  { %2074 = vmatprep.subr.bf16.mxu0 %v2844_v29  ;;  %2114 = vmatpush1.bf16.msra.mxu1 %v2887_v0 }
 0x109   :  { %2115 = vmatprep.subr.bf16.mxu1 %v2892_v3 }
 0x10b   :  { %2075 = vmatpush1.bf16.msra.mxu0 %v2842_v59 }
 0x10c   :  { %2076 = vmatprep.subr.bf16.mxu0 %v2847_v61  ;;  %2116 = vmatpush1.bf16.msra.mxu1 %v2890_v5 }
 0x10d   :  { %2117 = vmatprep.subr.bf16.mxu1 %v2895_v8 }
 0x10f   :  { %2077 = vmatpush1.bf16.msra.mxu0 %v2845_v63 }
 0x110   :  { %2078 = vmatprep.subr.bf16.mxu0 %v2850_v2  ;;  %2118 = vmatpush1.bf16.msra.mxu1 %v2893_v10 }
 0x111   :  { %2119 = vmatprep.subr.bf16.mxu1 %v2898_v12 }
 0x113   :  { %2079 = vmatpush2.bf16.msra.mxu0 %v2848_v4 }
 0x114   :  { %2080 = vmatprep.subr.bf16.mxu0 %v2853_v7  ;;  %2120 = vmatpush2.bf16.msra.mxu1 %v2896_v14 }
 0x115   :  { %2121 = vmatprep.subr.bf16.mxu1 %v2901_v17  ;;  %v332_v17 = vsub.s32 3, %v3074_v45 }
 0x117   :  { %2081 = vmatpush2.bf16.msra.mxu0 %v2851_v9 }
 0x118   :  { %2082 = vmatprep.subr.bf16.mxu0 %v2856_v11  ;;  %2122 = vmatpush2.bf16.msra.mxu1 %v2899_v19 }
 0x119   :  { %2123 = vmatprep.subr.bf16.mxu1 %v2904_v21  ;;  %v333_v21 = vrot.slane %v316_v53, %v332_v17 }
 0x11b   :  { %2083 = vmatpush2.bf16.msra.mxu0 %v2854_v13 }
 0x11c   :  { %2084 = vmatprep.subr.bf16.mxu0 %v2859_v15  ;;  %2124 = vmatpush2.bf16.msra.mxu1 %v2902_v25  ;;  %v328_v15 = vsub.s32 2, %v3074_v45 }
 0x11d   :  { %2125 = vmatprep.subr.bf16.mxu1 %v2907_v32 }
 0x11e   :  { %v329_v19 = vrot.slane %v316_v53, %v328_v15 }
 0x11f   :  { %2085 = vmatpush2.bf16.msra.mxu0 %v2857_v18 }
 0x120   :  { %2086 = vmatprep.subr.bf16.mxu0 %v2862_v20  ;;  %2126 = vmatpush2.bf16.msra.mxu1 %v2905_v37 }
 0x121   :  { %2127 = vmatprep.subr.bf16.mxu1 %v2910_v41 }
 0x123   :  { %2087 = vmatpush2.bf16.msra.mxu0 %v2860_v24 }
 0x124   :  { %2088 = vmatprep.subr.bf16.mxu0 %v2865_v26  ;;  %2128 = vmatpush2.bf16.msra.mxu1 %v2908_v43 }
 0x125   :  { %2129 = vmatprep.subr.bf16.mxu1 %v2913_v47 }
 0x127   :  { %2089 = vmatpush2.bf16.msra.mxu0 %v2863_v27 }
 0x128   :  { %2090 = vmatprep.subr.bf16.mxu0 %v2868_v28  ;;  %2130 = vmatpush2.bf16.msra.mxu1 %v2911_v23 }
 0x129   :  { %2131 = vmatprep.subr.bf16.mxu1 %v2916_v50  ;;  %v3019_v50 = vmov 1966171168  }
 0x12a   :  { %v1356_v35 = vpop.f32.mrf.mxu0 }
 0x12b   :  { %v1397_v36 = vpop.f32.mrf.mxu1  ;;  %2091 = vmatpush2.bf16.msra.mxu0 %v2866_v30  ;;  %v1357_v56 = vadd.f32 %v1356_v35, %v321_v22 }
 0x12c   :  { %v1358_v39 = vpop.f32.mrf.mxu0  ;;  %2092 = vmatprep.subr.bf16.mxu0 %v2871_v31  ;;  %2132 = vmatpush2.bf16.msra.mxu1 %v2914_v1  ;;  %v2514_v1 = vld.sshfl [vmem:[%s3152_s5] sm:$0x11 pattern:$0x75316420] }
 0x12d   :  { %v1399_v40 = vpop.f32.mrf.mxu1  ;;  %2133 = vmatprep.subr.bf16.mxu1 %v2919_v52  ;;  %v1359_v57 = vadd.f32 %v1358_v39, %v325_v55  ;;  %v1398_v29 = vadd.f32 %v1397_v36, %v1357_v56  ;;  %v2171_v52 = vcombine.high %v2514_v1, %v2514_v1  ;;  %v2153_v55 = vld [vmem:[#allocation2] sm:$0x1] }
 0x12e   :  { %v1360_v42 = vpop.f32.mrf.mxu0  ;;  %2156 = vperm.xlu0 %2527, %v2153_v55  }
 0x12f   :  { %v1401_v16 = vpop.f32.mrf.mxu1  ;;  %2093 = vmatpush2.bf16.msra.mxu0 %v2869_v38  ;;  %v1400_v59 = vadd.f32 %v1399_v40, %v1359_v57 }
 0x130   :  { %v1361_v44 = vpop.f32.mrf.mxu0  ;;  %2134 = vmatpush2.bf16.msra.mxu1 %v2917_v34 }
 0x131   :  { %v1402_v46 = vpop.f32.mrf.mxu1 }
 0x133   :  { %v1479_v48 = vpop.f32.mrf.mxu1 }
 0x135   :  { %v1481_v49 = vpop.f32.mrf.mxu1 }
 0x137   :  { %v1483_v51 = vpop.f32.mrf.mxu1 }
 0x138   :  { %v2173_v51 = vunpack.c.l.s4 %v3019_v50 }
 0x139   :  { %v1484_v6 = vpop.f32.mrf.mxu1 }
 0x13a   :  { %v2174_v6 = vunpack.c.0.s8 %v2173_v51 }
 0x13c   :  { %v2177_v34 = vsub.s32 %v2174_v6, %v3074_v45 }
 0x13e   :  { %v2185_v53 = vrot.slane %v2171_v52, %v2177_v34  ;;  %v2178_v22 = vrot.slane %v2514_v1, %v2177_v34 }
 0x16a   :  { %v1438_v58 = vpop.f32.mrf.mxu0 }
 0x16b   :  { %v1439_v60 = vadd.f32 %v1438_v58, %v1398_v29 }
 0x16c   :  { %v1440_v61 = vpop.f32.mrf.mxu0 }
 0x16d   :  { %v1480_v62 = vadd.f32 %v1479_v48, %v1439_v60  ;;  %v1441_v63 = vadd.f32 %v1440_v61, %v1400_v59  ;;  %v1730_v59 = vld [vmem:[%s3151_s4] sm:$0x3]  ;;  %s3020_s4 = smov [#allocation9]  }
 0x16e   :  { %v1442_v0 = vpop.f32.mrf.mxu0  ;;  %v1735_v60 = vrot.slane %v1730_v59, %v3122_v33  ;;  %v1739_v61 = vrot.slane %v1730_v59, %v324_v54  ;;  %s2242_s5 = sshll.u32 %s3020_s4, 4  ;;  %s2243_s5 = int_to_ptr.vmem [resolvable:$true] %s2242_s5 }
 0x16f   :  { %vm1650_vm1 = vcmp.gt.f32.partialorder %v1480_v62, 0.0  ;;  %v1654_v2 = vmul.f32 0.2, %v1480_v62  ;;  %v1482_v3 = vadd.f32 %v1481_v49, %v1441_v63  ;;  %s2984_s23 = scalar_lea.vmem %s2243_s5, 16  ;;  %s2988_s24 = scalar_lea.vmem %s2243_s5, 32 }
 0x170   :  { %v1443_v4 = vpop.f32.mrf.mxu0  ;;  %p2985_p1 = scmp.ne.s32.totalorder %s2243_s5, %s2984_s23  ;;  %p2989_p2 = scmp.lt.s32.totalorder %s2243_s5, %s2243_s5 }
 0x171   :  { %v1655_v5 = vmul.f32 0.2, %v1482_v3  ;;  %vm1651_vm2 = vcmp.gt.f32.partialorder %v1482_v3, 0.0  ;;  %v1658_v7 = vsel %vm1650_vm1, %v1480_v62, %v1654_v2  ;;  %p2990_p3 = scmp.lt.s32.totalorder %s2988_s24, %s2984_s23 }
 0x172   :  { %v1662_v12 = vpack.c.bf16 %v1658_v7, %v1658_v7 }
 0x173   :  { %v1520_v8 = vpop.f32.mrf.mxu1  ;;  %v1659_v9 = vsel %vm1651_vm2, %v1482_v3, %v1655_v5  ;;  %p2991_p4 = por %p2990_p3, %p2989_p2 }
 0x174   :  { %v1663_v11 = vpack.c.bf16 %v1659_v9, %v1659_v9  ;;  %v1521_v25 = vadd.f32 %v1520_v8, %v329_v19 }
 0x175   :  { %v1522_v10 = vpop.f32.mrf.mxu1  ;;  %p2992_p5 = pnand %p2991_p4, %p2985_p1 }
 0x176   :  { %2094 = vmatprep.mubr.bf16.mxu0 %v1663_v11  ;;  %v1523_v27 = vadd.f32 %v1522_v10, %v333_v21 }
 0x177   :  { %v1524_v13 = vpop.f32.mrf.mxu1  ;;  %2095 = vmatmul.mubr.bf16.vlgmr.msra.gmra.mxu0 %v1662_v12 }
 0x178   :  { %2220 = vmatprep.mubr.bf16.mxu0 %v2185_v53 }
 0x179   :  { %v1525_v14 = vpop.f32.mrf.mxu1 }
 0x1a9   :  { %v2157_v45 = vpop.permute.xlu0 %2156 }
 0x1aa   :  { %v1561_v18 = vpop.f32.mrf.mxu0  ;;  %v2162_v54 = vrot.slane %v2157_v45, %v3122_v33 }
 0x1ab   :  { %v1562_v28 = vadd.f32 %v1561_v18, %v1521_v25 }
 0x1ac   :  { %v1563_v20 = vpop.f32.mrf.mxu0 }
 0x1ad   :  { %v1564_v32 = vadd.f32 %v1563_v20, %v1523_v27 }
 0x1ae   :  { %v1565_v24 = vpop.f32.mrf.mxu0 }
 0x1b0   :  { %v1566_v26 = vpop.f32.mrf.mxu0 }
 0x1b2   :  { %v1643_v31 = vpop.f32.mrf.mxu0 }
 0x1b3   :  { %v1602_v30 = vpop.f32.mrf.mxu1 }
 0x1b4   :  { %v1603_v35 = vadd.f32 %v1602_v30, %v1562_v28  ;;  %v1645_v37 = vpop.f32.mrf.mxu0 }
 0x1b5   :  { %v1604_v36 = vpop.f32.mrf.mxu1 }
 0x1b6   :  { %v1644_v38 = vadd.f32 %v1643_v31, %v1603_v35  ;;  %v1605_v39 = vadd.f32 %v1604_v36, %v1564_v32  ;;  %v1647_v41 = vpop.f32.mrf.mxu0 }
 0x1b7   :  { %v1606_v40 = vpop.f32.mrf.mxu1 }
 0x1b8   :  { %vm1652_vm3 = vcmp.gt.f32.partialorder %v1644_v38, 0.0  ;;  %v1656_v42 = vmul.f32 0.2, %v1644_v38  ;;  %v1646_v16 = vadd.f32 %v1645_v37, %v1605_v39  ;;  %v1648_v44 = vpop.f32.mrf.mxu0 }
 0x1b9   :  { %v1607_v43 = vpop.f32.mrf.mxu1 }
 0x1ba   :  { %vm1653_vm4 = vcmp.gt.f32.partialorder %v1646_v16, 0.0  ;;  %v1657_v46 = vmul.f32 0.2, %v1646_v16  ;;  %v1660_v47 = vsel %vm1652_vm3, %v1644_v38, %v1656_v42 }
 0x1bb   :  { %v1664_v49 = vpack.c.bf16 %v1660_v47, %v1660_v47 }
 0x1bc   :  { %v1661_v48 = vsel %vm1653_vm4, %v1646_v16, %v1657_v46 }
 0x1bd   :  { %v1665_v23 = vpack.c.bf16 %v1661_v48, %v1661_v48 }
 0x1bf   :  { %2135 = vmatprep.mubr.bf16.mxu1 %v1665_v23 }
 0x1c0   :  { %2136 = vmatmul.mubr.bf16.vlgmr.msra.gmra.mxu1 %v1664_v49 }
 0x237   :  { %v2096_v56 = vpop.f32.mrf.mxu0 }
 0x238   :  { %v2097_v62 = vadd.f32 %v2096_v56, %v1735_v60 }
 0x239   :  { %v2098_v57 = vpop.f32.mrf.mxu0 }
 0x23a   :  { %v2099_v0 = vadd.f32 %v2098_v57, %v1739_v61 }
 0x23b   :  { %v2100_v29 = vpop.f32.mrf.mxu0 }
 0x23d   :  { %v2101_v58 = vpop.f32.mrf.mxu0 }
 0x280   :  { %v2137_v63 = vpop.f32.mrf.mxu1 }
 0x281   :  { %v2138_v2 = vadd.f32 %v2137_v63, %v2097_v62 }
 0x282   :  { %v2139_v3 = vpop.f32.mrf.mxu1 }
 0x283   :  { %vm2144_vm5 = vcmp.gt.f32.partialorder %v2138_v2, 0.0  ;;  %v2146_v4 = vmul.f32 0.2, %v2138_v2  ;;  %v2140_v5 = vadd.f32 %v2139_v3, %v2099_v0 }
 0x284   :  { %v2141_v7 = vpop.f32.mrf.mxu1 }
 0x285   :  { %vm2145_vm6 = vcmp.gt.f32.partialorder %v2140_v5, 0.0  ;;  %v2147_v8 = vmul.f32 0.2, %v2140_v5  ;;  %v2148_v9 = vsel %vm2144_vm5, %v2138_v2, %v2146_v4 }
 0x286   :  { %v2142_v10 = vpop.f32.mrf.mxu1  ;;  %v2150_v13 = vpack.c.bf16 %v2148_v9, %v2148_v9 }
 0x287   :  { %v2149_v11 = vsel %vm2145_vm6, %v2140_v5, %v2147_v8 }
 0x288   :  { %v2151_v12 = vpack.c.bf16 %v2149_v11, %v2149_v11 }
 0x28a   :  { %2202 = vmatprep.subr.bf16.mxu0 %v2151_v12 }
 0x28b   :  { %2203 = vmatpush1.bf16.xpose.msra.mxu0 %v2150_v13 }
 0x292   :  { %2221 = vmatmul.mubr.bf16.vlgmr.msra.gmra.mxu0 %v2178_v22 }
 0x352   :  { %v2222_v14 = vpop.f32.mrf.mxu0 }
 0x353   :  { %v2223_v15 = vadd.f32 %v2222_v14, %v2162_v54 }
 0x354   :  { %v2224_v17 = vpop.f32.mrf.mxu0 }
 0x355   :  { %v2515_v18 = vmul.f32 -1.442695, %v2223_v15 }
 0x356   :  { %v2225_v19 = vpop.f32.mrf.mxu0 }
 0x357   :  { %2920 = vpow2.f32 %v2515_v18 }
 0x358   :  { %v2226_v20 = vpop.f32.mrf.mxu0 }
 0x364   :  { %v2921_v21 = vpop.eup %2920 }
 0x365   :  { %v2231_v24 = vadd.f32 1.0, %v2921_v21 }
 0x367   :  { %2922 = vrcp.f32 %v2231_v24 }
 0x374   :  { %v2923_v25 = vpop.eup %2922 }
 0x375   :  { %2235 = vst.msk [vmem:[#allocation9] sm:$0x1] %vm2234_vm7, %v2923_v25 }
 0x376   :  { %2995 = shalt.err (!%p2992_p5)
}
 0x377   :  { %2245 = dma.vmem_to_hbm [thread:$0]  %s2243_s5, 16, %s3154_s7, [#allocation5]  }
 0x378   :  { %3008 = dma.done.wait [#allocation5], 16  }
 0x379   :  { %3009 = vsyncadd [#allocation5], 4294967280 }
 0x37a   :  { %2249 = vsyncpa [#allocation4], 1 }
 0x37b   :  { %2250 = vsyncpa [#allocation7], 1 }
 0x37c   :  { %2251 = vsyncpa [#allocation5], 1 }

</bundles_post_ra>
